<compile_context>
chip_gen: v6e
topology: v6e:2x2x1
jax: 0.10.0
libtpu: 0.0.40
codegen_flags: <defaults>
</compile_context>

<pallas_src>
import math

import jax
import jax.numpy as jnp
from jax import lax
from jax.experimental import pallas as pl
from jax.experimental.pallas import tpu as pltpu


def _make_kernel(gamma, la, margin, cN):
    def kernel(x_ref, fcT_ref, tgt_ref, w_ref, gT_ref,
               logits_ref, wnll_ref, perw_ref):
        x = x_ref[...].astype(jnp.float32)            # [BT, D]
        fcT = fcT_ref[...].astype(jnp.float32)        # [SK, D]
        BT = x.shape[0]
        D = x.shape[1]

        # --- center normalization (tiny [SK, D]: one-vreg lane reduce + rsqrt)
        c_ss = jnp.sum(fcT * fcT, axis=1, keepdims=True)          # [SK, 1]
        cnT = fcT * lax.rsqrt(jnp.maximum(c_ss, 1e-24))           # [SK, D]

        # --- simInd^T = cnT @ x^T -> [SK, BT], lane-dense over the batch -----
        sim = lax.dot_general(cnT, x, (((1,), (1,)), ((), ())),
                              preferred_element_type=jnp.float32)  # [SK, BT]

        # Per-sample ||x||^2 as [1, BT] on the MXU (no lane reduce, no transpose)
        xx = x * x
        ones_row = jnp.ones((1, D), jnp.float32)
        x_ss = lax.dot_general(ones_row, xx, (((1,), (1,)), ((), ())),
                               preferred_element_type=jnp.float32)  # [1, BT]
        inv_x = lax.rsqrt(jnp.maximum(x_ss, 1e-24))                 # [1, BT]
        sim = sim * inv_x                                           # [SK, BT]

        # --- intra-class softmax aggregation (constant shift; |sim| <= 1 so
        # the exp argument is bounded in [-2*gamma, 0] and the shift cancels
        # in the per-group quotient) -------------------------------------------
        e = jnp.exp(gamma * (sim - 1.0))                            # [SK, BT]
        GT = gT_ref[...]                                            # [cN, SK]
        gsum = jnp.dot(GT, e, preferred_element_type=jnp.float32)        # [cN, BT]
        gnum = jnp.dot(GT, e * sim, preferred_element_type=jnp.float32)  # [cN, BT]
        simClass = gnum / gsum                                      # [cN, BT]

        # Uniform margin (matches marginM[arange(B), :] = margin in the module).
        logits = la * (simClass - margin)                           # [cN, BT]
        logits_ref[...] = logits.astype(logits_ref.dtype)           # lane-dense store

        # --- weighted CE per-sample pieces (sublane reduces over cN only) ----
        m = jnp.max(logits, axis=0, keepdims=True)                  # [1, BT]
        lse = m + jnp.log(jnp.sum(jnp.exp(logits - m), axis=0, keepdims=True))

        tgt = tgt_ref[...]                                          # [1, BT] int32
        cls = lax.broadcasted_iota(jnp.int32, (cN, BT), 0)          # [cN, BT]
        onehot = (cls == tgt).astype(jnp.float32)                   # [cN, BT]
        tw = onehot * w_ref[...]                                    # [cN, BT] (w: [cN,1])
        per_w = jnp.sum(tw, axis=0, keepdims=True)                  # [1, BT] = w[target]
        tgt_logit = jnp.sum(tw * logits, axis=0, keepdims=True)     # w[t]*logits[t]

        # weighted nll = w[t]*(lse - logits[t])
        wnll_ref[...] = per_w * lse - tgt_logit
        perw_ref[...] = per_w

    return kernel


def softtriple_bias_forward(x, fc, target, pos_weight, mask_f, group_oh_T, *,
                            cN, la, gamma, margin, tau, mask_sum, block_b=2048):
    B, D = x.shape
    SK = fc.shape[1]
    if B <= block_b:
        BT = B
    else:
        BT = block_b
        assert BT % 128 == 0, "batch tile must be a multiple of 128 (lane axis)"
    # TODO(synk): pad / mask the last ragged tile when B % BT != 0.
    assert B % BT == 0, "batch must be divisible by the batch tile"
    nbt = B // BT

    # Tiny wrapper-side reshapes only (the big x stream is passed untouched).
    fcT = jnp.swapaxes(fc, 0, 1)                              # [SK, D] (~1 KiB)
    tgt2d = target.astype(jnp.int32).reshape(1, B)            # [1, B]
    w2d = pos_weight.astype(jnp.float32).reshape(cN, 1)       # [cN, 1]

    kernel = _make_kernel(gamma, la, margin, cN)

    grid_spec = pltpu.PrefetchScalarGridSpec(
        num_scalar_prefetch=0,
        grid=(nbt,),
        in_specs=[
            pl.BlockSpec((BT, D), lambda i: (i, 0)),      # x       (tiled over B)
            pl.BlockSpec((SK, D), lambda i: (0, 0)),      # fc^T    (resident)
            pl.BlockSpec((1, BT), lambda i: (0, i)),      # target  (tiled, int32)
            pl.BlockSpec((cN, 1), lambda i: (0, 0)),      # class weights
            pl.BlockSpec((cN, SK), lambda i: (0, 0)),     # group one-hot^T
        ],
        out_specs=(
            pl.BlockSpec((cN, BT), lambda i: (0, i)),     # logits^T (lane-dense)
            pl.BlockSpec((1, BT), lambda i: (0, i)),      # weighted nll per sample
            pl.BlockSpec((1, BT), lambda i: (0, i)),      # w[target] per sample
        ),
    )

    # No cross-tile accumulation inside the kernel -> batch axis is "parallel"
    # (splits across the 2 TensorCores on v7x; no-op on v5e/v6e).
    logits_t, wnll, perw = pl.pallas_call(
        kernel,
        out_shape=(
            jax.ShapeDtypeStruct((cN, B), jnp.float32),
            jax.ShapeDtypeStruct((1, B), jnp.float32),
            jax.ShapeDtypeStruct((1, B), jnp.float32),
        ),
        grid_spec=grid_spec,
        compiler_params=pltpu.CompilerParams(
            dimension_semantics=("parallel",)),
    )(x, fcT, tgt2d, w2d, group_oh_T)   # native dtypes; cast in-kernel

    # --- wrapper finalize: O(B) scalar reductions + O(SK^2)=64-elem regularizer
    ce = jnp.sum(wnll) / jnp.sum(perw)

    fc32 = fc.astype(jnp.float32)
    cn = fc32 / jnp.maximum(jnp.linalg.norm(fc32, axis=0, keepdims=True), 1e-12)
    simCenter = cn.T @ cn
    arg = jnp.maximum(2.0 + 1e-5 - 2.0 * simCenter, 0.0)
    reg = jnp.sum(jnp.sqrt(arg) * mask_f) / (mask_sum * 2.0)

    loss = ce + tau * reg
    logits = jnp.swapaxes(logits_t, 0, 1)                     # [B, cN] module layout
    return loss, logits


def reference_forward(x, fc, target, pos_weight, mask_f, *,
                      cN, K_idx, la, gamma, margin, tau, mask_sum):
    x = x.astype(jnp.float32)
    fc = fc.astype(jnp.float32)
    xn = x / jnp.maximum(jnp.linalg.norm(x, axis=1, keepdims=True), 1e-12)
    cn = fc / jnp.maximum(jnp.linalg.norm(fc, axis=0, keepdims=True), 1e-12)
    simInd = xn @ cn
    cols = []
    for idx in range(cN):
        s = simInd[:, K_idx[idx]:K_idx[idx + 1]]
        p = jax.nn.softmax(s * gamma, axis=1)
        cols.append(jnp.sum(p * s, axis=1))
    simClass = jnp.stack(cols, axis=1)
    logits = la * (simClass - margin)
    logp = jax.nn.log_softmax(logits, axis=1)
    nll = -jnp.take_along_axis(logp, target[:, None], axis=1)[:, 0]
    w_t = pos_weight[target]
    ce = jnp.sum(nll * w_t) / jnp.sum(w_t)
    simCenter = cn.T @ cn
    arg = jnp.maximum(2.0 + 1e-5 - 2.0 * simCenter, 0.0)
    reg = jnp.sum(jnp.sqrt(arg) * mask_f) / (mask_sum * 2.0)
    return ce + tau * reg, logits


if __name__ == "__main__":
    # Hyper-parameters (see header comment).
    dim, cN, K = 32, 4, 2
    Ks = [K] * cN
    K_idx = [0]
    for k in Ks:
        K_idx.append(K_idx[-1] + k)
    SK = K_idx[-1]
    la = 20.0
    gamma = 1.0 / 0.1          # self.gamma = 1/gamma
    tau = 0.2
    margin = 0.01 * 1.0        # margin * margin_scale

    # Deterministic parameter construction.
    key = jax.random.PRNGKey(0)
    k_fc, k_data = jax.random.split(key, 2)
    # kaiming_uniform_(fc, a=sqrt(5)): bound = 1/sqrt(fan_in = SK)
    bound = 1.0 / math.sqrt(SK)
    fc = jax.random.uniform(k_fc, (dim, SK), jnp.float32, -bound, bound)
    pos_weight = jnp.ones((cN,), jnp.float32)   # positive_weight, len == cN

    # Boolean weight mask (within-class strict upper triangle) as float.
    mask = []
    for i in range(cN):
        for j in range(Ks[i]):
            row = sum(Ks[:i]) + j
            col_end = sum(Ks[:i + 1])
            r = [0.0] * SK
            for c in range(row + 1, col_end):
                r[c] = 1.0
            mask.append(r)
    mask_f = jnp.asarray(mask, dtype=jnp.float32)
    mask_sum = float(mask_f.sum())

    # Group-membership one-hot, transposed: GT[c, j] = 1 iff proxy j in class c.
    class_of = []
    for c in range(cN):
        class_of += [c] * Ks[c]
    group_oh_T = jnp.asarray(
        [[1.0 if class_of[j] == c else 0.0 for j in range(SK)] for c in range(cN)],
        dtype=jnp.float32)                                    # [cN, SK]

    # (B, block_b) pairs: small single-tile case + a multi-tile case that
    # exercises the "parallel" batch grid axis.
    for B, blk in ((8, 2048), (256, 128)):
        k_x, k_t = jax.random.split(jax.random.fold_in(k_data, B), 2)
        x = jax.random.normal(k_x, (B, dim), jnp.float32)
        target = jax.random.randint(k_t, (B,), 0, cN)

        loss, logits = softtriple_bias_forward(
            x, fc, target, pos_weight, mask_f, group_oh_T,
            cN=cN, la=la, gamma=gamma, margin=margin, tau=tau,
            mask_sum=mask_sum, block_b=blk)
        loss = jax.block_until_ready(loss)
        logits = jax.block_until_ready(logits)

        loss_ref, logits_ref = reference_forward(
            x, fc, target, pos_weight, mask_f,
            cN=cN, K_idx=K_idx, la=la, gamma=gamma, margin=margin, tau=tau,
            mask_sum=mask_sum)

        assert jnp.allclose(loss, loss_ref, rtol=1e-4, atol=1e-4), \
            (B, loss, loss_ref)
        assert jnp.allclose(logits, logits_ref, rtol=1e-4, atol=1e-4), \
            (B, float(jnp.max(jnp.abs(logits - logits_ref))))

    # TODO(synk): bias / trans_bias / pl_regulation / custom_cross_entropy /
    # return_class_info / 3-D-input / att_map branches are disabled by this
    # configuration and not ported.
    print("KERNEL_OK")
</pallas_src>

<mosaic_0001>
module attributes {stable_mosaic.version = 11 : i64} {
  func.func @kernel(%arg0: i32, %arg1: memref<8x32xf32, #tpu.memory_space<vmem>>, %arg2: memref<8x32xf32, #tpu.memory_space<vmem>>, %arg3: memref<1x8xi32, #tpu.memory_space<vmem>>, %arg4: memref<4x1xf32, #tpu.memory_space<vmem>>, %arg5: memref<4x8xf32, #tpu.memory_space<vmem>>, %arg6: memref<4x8xf32, #tpu.memory_space<vmem>>, %arg7: memref<1x8xf32, #tpu.memory_space<vmem>>, %arg8: memref<1x8xf32, #tpu.memory_space<vmem>>) attributes {dimension_semantics = [#tpu.dimension_semantics<parallel>], iteration_bounds = array<i64: 1>, scalar_prefetch = 0 : i64, scratch_operands = 0 : i64, tpu.core_type = #tpu.core_type<tc>, window_params = [{transform_indices = @transform_0, window_bounds = array<i64: 8, 32>}, {pipeline_mode = #tpu.pipeline_mode<synchronous>, transform_indices = @transform_1, window_bounds = array<i64: 8, 32>}, {transform_indices = @transform_2, window_bounds = array<i64: 1, 8>}, {pipeline_mode = #tpu.pipeline_mode<synchronous>, transform_indices = @transform_3, window_bounds = array<i64: 4, 1>}, {pipeline_mode = #tpu.pipeline_mode<synchronous>, transform_indices = @transform_4, window_bounds = array<i64: 4, 8>}, {transform_indices = @transform_5, window_bounds = array<i64: 4, 8>}, {transform_indices = @transform_6, window_bounds = array<i64: 1, 8>}, {transform_indices = @transform_7, window_bounds = array<i64: 1, 8>}]} {
    %c0 = arith.constant 0 : index
    %c0_0 = arith.constant 0 : index
    %0 = vector.load %arg1[%c0, %c0_0] : memref<8x32xf32, #tpu.memory_space<vmem>>, vector<8x32xf32>
    %c0_1 = arith.constant 0 : index
    %c0_2 = arith.constant 0 : index
    %1 = vector.load %arg2[%c0_1, %c0_2] : memref<8x32xf32, #tpu.memory_space<vmem>>, vector<8x32xf32>
    %2 = arith.mulf %1, %1 : vector<8x32xf32>
    %cst = arith.constant dense<0.000000e+00> : vector<8xf32>
    %3 = vector.multi_reduction <add>, %2, %cst [1] : vector<8x32xf32> to vector<8xf32>
    %4 = vector.shape_cast %3 : vector<8xf32> to vector<8x1xf32>
    %cst_3 = arith.constant 1.000000e-24 : f32
    %5 = vector.broadcast %cst_3 : f32 to vector<8x1xf32>
    %6 = arith.maximumf %4, %5 : vector<8x1xf32>
    %7 = math.rsqrt %6 : vector<8x1xf32>
    %8 = vector.broadcast %7 : vector<8x1xf32> to vector<8x32xf32>
    %9 = arith.mulf %1, %8 : vector<8x32xf32>
    %cst_4 = arith.constant dense<0.000000e+00> : vector<8x8xf32>
    %10 = tpu.matmul %9, %0, %cst_4 {dimension_numbers = #tpu.dot_dimension_numbers<[1], [1], [0], [0], [0, 0, 1, 0], [], []>} : vector<8x32xf32>, vector<8x32xf32>, vector<8x8xf32> -> vector<8x8xf32>
    %11 = arith.mulf %0, %0 : vector<8x32xf32>
    %cst_5 = arith.constant 1.000000e+00 : f32
    %12 = vector.broadcast %cst_5 : f32 to vector<1x32xf32>
    %cst_6 = arith.constant dense<0.000000e+00> : vector<1x8xf32>
    %13 = tpu.matmul %12, %11, %cst_6 {dimension_numbers = #tpu.dot_dimension_numbers<[1], [1], [0], [0], [0, 0, 1, 0], [], []>} : vector<1x32xf32>, vector<8x32xf32>, vector<1x8xf32> -> vector<1x8xf32>
    %cst_7 = arith.constant 1.000000e-24 : f32
    %14 = vector.broadcast %cst_7 : f32 to vector<1x8xf32>
    %15 = arith.maximumf %13, %14 : vector<1x8xf32>
    %16 = math.rsqrt %15 : vector<1x8xf32>
    %17 = vector.broadcast %16 : vector<1x8xf32> to vector<8x8xf32>
    %18 = arith.mulf %10, %17 : vector<8x8xf32>
    %cst_8 = arith.constant 1.000000e+00 : f32
    %19 = vector.broadcast %cst_8 : f32 to vector<8x8xf32>
    %20 = arith.subf %18, %19 : vector<8x8xf32>
    %cst_9 = arith.constant 1.000000e+01 : f32
    %21 = vector.broadcast %cst_9 : f32 to vector<8x8xf32>
    %22 = arith.mulf %21, %20 : vector<8x8xf32>
    %23 = math.exp %22 : vector<8x8xf32>
    %c0_10 = arith.constant 0 : index
    %c0_11 = arith.constant 0 : index
    %24 = vector.load %arg5[%c0_10, %c0_11] : memref<4x8xf32, #tpu.memory_space<vmem>>, vector<4x8xf32>
    %cst_12 = arith.constant dense<0.000000e+00> : vector<4x8xf32>
    %25 = tpu.matmul %24, %23, %cst_12 {dimension_numbers = #tpu.dot_dimension_numbers<[1], [0], [0], [1], [0, 0, 1, 1], [], []>} : vector<4x8xf32>, vector<8x8xf32>, vector<4x8xf32> -> vector<4x8xf32>
    %26 = arith.mulf %23, %18 : vector<8x8xf32>
    %cst_13 = arith.constant dense<0.000000e+00> : vector<4x8xf32>
    %27 = tpu.matmul %24, %26, %cst_13 {dimension_numbers = #tpu.dot_dimension_numbers<[1], [0], [0], [1], [0, 0, 1, 1], [], []>} : vector<4x8xf32>, vector<8x8xf32>, vector<4x8xf32> -> vector<4x8xf32>
    %28 = arith.divf %27, %25 : vector<4x8xf32>
    %cst_14 = arith.constant 0.00999999977 : f32
    %29 = vector.broadcast %cst_14 : f32 to vector<4x8xf32>
    %30 = arith.subf %28, %29 : vector<4x8xf32>
    %cst_15 = arith.constant 2.000000e+01 : f32
    %31 = vector.broadcast %cst_15 : f32 to vector<4x8xf32>
    %32 = arith.mulf %31, %30 : vector<4x8xf32>
    %c0_16 = arith.constant 0 : index
    %c0_17 = arith.constant 0 : index
    %33 = vector.load %arg6[%c0_16, %c0_17] : memref<4x8xf32, #tpu.memory_space<vmem>>, vector<4x8xf32>
    tpu.vector_store %arg6[%c0_16, %c0_17], %32 {strides = array<i32>} : memref<4x8xf32, #tpu.memory_space<vmem>>, vector<4x8xf32>,
    %cst_18 = arith.constant dense<0xFF800000> : vector<8xf32>
    %34 = vector.multi_reduction <maximumf>, %32, %cst_18 [0] : vector<4x8xf32> to vector<8xf32>
    %35 = vector.shape_cast %34 : vector<8xf32> to vector<1x8xf32>
    %36 = vector.broadcast %35 : vector<1x8xf32> to vector<4x8xf32>
    %37 = arith.subf %32, %36 : vector<4x8xf32>
    %38 = math.exp %37 : vector<4x8xf32>
    %cst_19 = arith.constant dense<0.000000e+00> : vector<8xf32>
    %39 = vector.multi_reduction <add>, %38, %cst_19 [0] : vector<4x8xf32> to vector<8xf32>
    %40 = vector.shape_cast %39 : vector<8xf32> to vector<1x8xf32>
    %41 = math.log %40 : vector<1x8xf32>
    %42 = arith.addf %35, %41 : vector<1x8xf32>
    %c0_20 = arith.constant 0 : index
    %c0_21 = arith.constant 0 : index
    %43 = vector.load %arg3[%c0_20, %c0_21] : memref<1x8xi32, #tpu.memory_space<vmem>>, vector<1x8xi32>
    %44 = tpu.iota {dimensions = array<i32: 0>} : vector<4x8xi32>
    %45 = vector.broadcast %43 : vector<1x8xi32> to vector<4x8xi32>
    %46 = arith.cmpi eq, %44, %45 : vector<4x8xi32>
    %47 = arith.extui %46 : vector<4x8xi1> to vector<4x8xi32>
    %48 = arith.sitofp %47 : vector<4x8xi32> to vector<4x8xf32>
    %c0_22 = arith.constant 0 : index
    %c0_23 = arith.constant 0 : index
    %49 = vector.load %arg4[%c0_22, %c0_23] : memref<4x1xf32, #tpu.memory_space<vmem>>, vector<4x1xf32>
    %50 = vector.broadcast %49 : vector<4x1xf32> to vector<4x8xf32>
    %51 = arith.mulf %48, %50 : vector<4x8xf32>
    %cst_24 = arith.constant dense<0.000000e+00> : vector<8xf32>
    %52 = vector.multi_reduction <add>, %51, %cst_24 [0] : vector<4x8xf32> to vector<8xf32>
    %53 = vector.shape_cast %52 : vector<8xf32> to vector<1x8xf32>
    %54 = arith.mulf %51, %32 : vector<4x8xf32>
    %cst_25 = arith.constant dense<0.000000e+00> : vector<8xf32>
    %55 = vector.multi_reduction <add>, %54, %cst_25 [0] : vector<4x8xf32> to vector<8xf32>
    %56 = vector.shape_cast %55 : vector<8xf32> to vector<1x8xf32>
    %57 = arith.mulf %53, %42 : vector<1x8xf32>
    %58 = arith.subf %57, %56 : vector<1x8xf32>
    %c0_26 = arith.constant 0 : index
    %c0_27 = arith.constant 0 : index
    %59 = vector.load %arg7[%c0_26, %c0_27] : memref<1x8xf32, #tpu.memory_space<vmem>>, vector<1x8xf32>
    tpu.vector_store %arg7[%c0_26, %c0_27], %58 {strides = array<i32>} : memref<1x8xf32, #tpu.memory_space<vmem>>, vector<1x8xf32>,
    %c0_28 = arith.constant 0 : index
    %c0_29 = arith.constant 0 : index
    %60 = vector.load %arg8[%c0_28, %c0_29] : memref<1x8xf32, #tpu.memory_space<vmem>>, vector<1x8xf32>
    tpu.vector_store %arg8[%c0_28, %c0_29], %53 {strides = array<i32>} : memref<1x8xf32, #tpu.memory_space<vmem>>, vector<1x8xf32>,
    return
  }
  func.func @transform_0(%arg0: i32) -> (i32, i32) {
    %c0_i32 = arith.constant 0 : i32
    %c0_i32_0 = arith.constant 0 : i32
    return %arg0, %c0_i32 : i32, i32
  }
  func.func @transform_1(%arg0: i32) -> (i32, i32) {
    %c0_i32 = arith.constant 0 : i32
    %c0_i32_0 = arith.constant 0 : i32
    %c0_i32_1 = arith.constant 0 : i32
    return %c0_i32, %c0_i32_0 : i32, i32
  }
  func.func @transform_2(%arg0: i32) -> (i32, i32) {
    %c0_i32 = arith.constant 0 : i32
    %c0_i32_0 = arith.constant 0 : i32
    return %c0_i32, %arg0 : i32, i32
  }
  func.func @transform_3(%arg0: i32) -> (i32, i32) {
    %c0_i32 = arith.constant 0 : i32
    %c0_i32_0 = arith.constant 0 : i32
    %c0_i32_1 = arith.constant 0 : i32
    return %c0_i32, %c0_i32_0 : i32, i32
  }
  func.func @transform_4(%arg0: i32) -> (i32, i32) {
    %c0_i32 = arith.constant 0 : i32
    %c0_i32_0 = arith.constant 0 : i32
    %c0_i32_1 = arith.constant 0 : i32
    return %c0_i32, %c0_i32_0 : i32, i32
  }
  func.func @transform_5(%arg0: i32) -> (i32, i32) {
    %c0_i32 = arith.constant 0 : i32
    %c0_i32_0 = arith.constant 0 : i32
    return %c0_i32, %arg0 : i32, i32
  }
  func.func @transform_6(%arg0: i32) -> (i32, i32) {
    %c0_i32 = arith.constant 0 : i32
    %c0_i32_0 = arith.constant 0 : i32
    return %c0_i32, %arg0 : i32, i32
  }
  func.func @transform_7(%arg0: i32) -> (i32, i32) {
    %c0_i32 = arith.constant 0 : i32
    %c0_i32_0 = arith.constant 0 : i32
    return %c0_i32, %arg0 : i32, i32
  }
}

</mosaic_0001>

<bundles_post_ra>
// kernel: tpu_custom_call.1
= control target key start
LH: loop header
LB: loop body
LE: loop exit
PB: predicated region body
PF: predicated region fallthrough
CT: control target
= control target key end

     0   :  { %13 = vsyncpa [#allocation3], 0  ;;  %s732_s0 = inlined_call_operand.hbm [shape: f32[8,32], index: 0, kind: input, shape index: {}]   ;;  %s733_s1 = inlined_call_operand.hbm [shape: f32[8,32], index: 1, kind: input, shape index: {}]   ;;  %s734_s2 = inlined_call_operand.vmem [shape: s32[1,8], index: 2, kind: input, shape index: {}]   ;;  %s735_s3 = inlined_call_operand.vmem [shape: f32[4,1], index: 3, kind: input, shape index: {}]   ;;  %s736_s4 = inlined_call_operand.vmem [shape: f32[4,8], index: 4, kind: input, shape index: {}]   ;;  %s737_s5 = inlined_call_operand.hbm [shape: f32[4,8], index: 5, kind: output, shape index: {0}]   ;;  %s738_s6 = inlined_call_operand.hbm [shape: f32[1,8], index: 6, kind: output, shape index: {1}]   ;;  %s739_s7 = inlined_call_operand.hbm [shape: f32[1,8], index: 7, kind: output, shape index: {2}]  }
   0x1   :  { %14 = vsyncpa [#allocation6], 0 }
   0x2   :  { %15 = vsyncpa [#allocation4], 0 }
   0x3   :  { %16 = vsyncpa [#allocation9], 0  ;;  %s643_s24 = smov [#allocation2]   ;;  %s644_s26 = smov [#allocation5]  }
   0x4   :  { %s23_s25 = sshll.u32 %s643_s24, 4  ;;  %s33_s27 = sshll.u32 %s644_s26, 4  ;;  %s24_s25 = int_to_ptr.vmem [resolvable:$true] %s23_s25  ;;  %s34_s27 = int_to_ptr.vmem [resolvable:$true] %s33_s27 }
   0x5   :  { %s543_s28 = scalar_lea.vmem %s24_s25, 128  ;;  %p548_p1 = scmp.lt.s32.totalorder %s24_s25, %s24_s25 }
   0x6   :  { %p544_p0 = scmp.ne.s32.totalorder %s24_s25, %s543_s28  ;;  %p549_p2 = scmp.lt.s32.totalorder %s543_s28, %s543_s28 }
   0x8   :  { %p550_p3 = por %p549_p2, %p548_p1 }
   0xa   :  { %p551_p4 = pnand %p550_p3, %p544_p0 }
   0xc   :  { %554 = shalt.err (!%p551_p4)
}
   0xd   :  { %26 = dma.hbm_to_vmem [thread:$0]  %s732_s0, 128, %s24_s25, [#allocation3]  }
   0xe   :  { %s563_s8 = scalar_lea.vmem %s34_s27, 128  ;;  %p568_p6 = scmp.lt.s32.totalorder %s34_s27, %s34_s27 }
   0xf   :  { %p564_p5 = scmp.ne.s32.totalorder %s34_s27, %s563_s8  ;;  %p569_p7 = scmp.lt.s32.totalorder %s563_s8, %s563_s8 }
  0x11   :  { %p570_p8 = por %p569_p7, %p568_p6 }
  0x13   :  { %p571_p9 = pnand %p570_p8, %p564_p5 }
  0x15   :  { %574 = shalt.err (!%p571_p9)
}
  0x16   :  { %36 = dma.hbm_to_vmem [thread:$0]  %s733_s1, 128, %s34_s27, [#allocation6]  }
  0x17   :  { %635 = dma.done.wait [#allocation3], 128  }
  0x18   :  { %636 = vsyncadd [#allocation3], 4294967168 }
  0x19   :  { %637 = dma.done.wait [#allocation6], 128  }
  0x1a   :  { %638 = vsyncadd [#allocation6], 4294967168  ;;  %v645_v0 = vmov 0.0   ;;  %vm646_vm0 = vmmov 0   ;;  %v50_v1 = vld [vmem:[#allocation5] sm:$0xff]  ;;  %vm52_vm1 = vcmask 261120   ;;  %v214_v16 = vlaneseq }
  0x1b   :  { %498 = vmatprep.subr.mxu1 %v645_v0  ;;  %500 = vmatprep.mubr.msk.f32.mxu1 %vm646_vm0, %v645_v0  ;;  %v49_v2 = vld [vmem:[#allocation2] sm:$0xff]  ;;  %v51_v3 = vmul.f32 %v50_v1, %v50_v1  ;;  %v647_v6 = vmov 1.0   ;;  %v648_v14 = vmov 0   ;;  %vm224_vm2 = vcmask 64512  }
  0x1c   :  { %493 = vmatprep.subr.mxu0 %v645_v0  ;;  %495 = vmatprep.mubr.msk.f32.mxu0 %vm646_vm0, %v645_v0  ;;  %v135_v4 = vmul.f32 %v49_v2, %v49_v2  ;;  %v405_v13 = vld [vmem:[%s735_s3] sm:$0xf]  ;;  %v215_v17 = vshrl.u32 %v214_v16, 7  ;;  %vm373_vm4 = vcmask 60416   ;;  %vm429_vm5 = vcmask 57344  }
  0x1d   :  { %494 = vmatpush3.xpose.msk.msra.mxu0 %vm52_vm1, %v49_v2  ;;  %v53_v5 = vsel %vm52_vm1, %v51_v3, 0.0  ;;  %522 = vset.pattern.permute.xlu0 %v648_v14  ;;  %v223_v27 = vld [vmem:[%s736_s4] sm:$0xf] }
  0x1e   :  { %503 = vmatprep.subr.mxu0 %v645_v0  ;;  %499 = vmatpush3.xpose.msk.msra.mxu1 %vm52_vm1, %v135_v4  ;;  %v216_v18 = vsub.s32 0, %v215_v17  ;;  %v483_v30 = vld [vmem:[%s734_s2] ss:$0 sm:$0xff]  ;;  %s649_s2 = smov [#allocation7]  }
  0x1f   :  { %54 = vadd.xlane.f32.xlu0 %v53_v5  ;;  %508 = vmatprep.subr.mxu1 %v645_v0  ;;  %vm402_vm3 = vcmp.eq.s32.totalorder %v215_v17, %v483_v30  ;;  %s438_s4 = sshll.u32 %s649_s2, 4  ;;  %s439_s4 = int_to_ptr.vmem [resolvable:$true] %s438_s4 }
  0x20   :  { %v484_v31 = vsel %vm402_vm3, 1.0, %v645_v0  ;;  %s575_s14 = scalar_lea.vmem %s439_s4, 64  ;;  %p580_p11 = scmp.lt.s32.totalorder %s439_s4, %s439_s4 }
  0x21   :  { %501 = vmatmul.mubr.msk.f32.vlgmr.msra.gmra.mxu1 %vm52_vm1, %v647_v6  ;;  %p576_p10 = scmp.ne.s32.totalorder %s439_s4, %s575_s14  ;;  %p581_p12 = scmp.lt.s32.totalorder %s575_s14, %s575_s14 }
  0x22   :  { %510 = vmatprep.mubr.msk.f32.mxu1 %vm646_vm0, %v645_v0 }
  0x23   :  { %p582_p13 = por %p581_p12, %p580_p11 }
  0x25   :  { %p583_p0 = pnand %p582_p13, %p576_p10 }
  0x35   :  { %408 = vperm.xlu0 %522, %v405_v13  }
  0xa8   :  { %v55_v7 = vpop.xlane.xlu0 %54 }
  0xa9   :  { %v56_v8 = vmax.f32 %v55_v7, 1e-24 }
  0xab   :  { %523 = vrsqrt.f32 %v56_v8 }
  0xb0   :  { %v409_v32 = vpop.permute.xlu0 %408 }
  0xb1   :  { %v411_v33 = vmul.f32 %v484_v31, %v409_v32 }
  0xb3   :  { %v412_v34 = vsel %vm373_vm4, %v411_v33, 0.0 }
  0xb4   :  { %v413_v35 = vrot.slane %v412_v34, 4 }
  0xb6   :  { %v414_v36 = vadd.f32 %v413_v35, %v412_v34 }
  0xb8   :  { %v524_v9 = vpop.eup %523  ;;  %v415_v37 = vrot.slane %v414_v36, 2 }
  0xb9   :  { %v58_v10 = vmul.f32 %v524_v9, %v50_v1 }
  0xba   :  { %v416_v38 = vadd.f32 %v415_v37, %v414_v36 }
  0xbb   :  { %496 = vmatmul.mubr.msk.f32.vlgmr.msra.gmra.mxu0 %vm52_vm1, %v58_v10 }
  0xbc   :  { %505 = vmatprep.mubr.msk.f32.mxu0 %vm646_vm0, %v645_v0  ;;  %v417_v39 = vrot.slane %v416_v38, 1 }
  0xbe   :  { %v418_v40 = vadd.f32 %v417_v39, %v416_v38 }
  0xc0   :  { %431 = vst.msk [vmem:[#allocation10] sm:$0x1] %vm429_vm5, %v418_v40 }
  0xe1   :  { %v208_v11 = vpop.f32.mrf.mxu1 }
  0xe2   :  { %v212_v15 = vmax.f32 %v208_v11, 1e-24 }
  0xe3   :  { %v502_v12 = vpop.f32.mrf.mxu1 }
  0xe4   :  { %525 = vrsqrt.f32 %v212_v15 }
  0xf1   :  { %v526_v19 = vpop.eup %525 }
  0xf2   :  { %v217_v20 = vrot.slane %v526_v19, %v216_v18 }
 0x17b   :  { %v131_v21 = vpop.f32.mrf.mxu0 }
 0x17c   :  { %v218_v22 = vmul.f32 %v217_v20, %v131_v21 }
 0x17d   :  { %v497_v23 = vpop.f32.mrf.mxu0 }
 0x17e   :  { %v479_v24 = vadd.f32 -1.0, %v218_v22 }
 0x180   :  { %v220_v25 = vmul.f32 10.0, %v479_v24 }
 0x182   :  { %v221_v26 = vmul.f32 1.442695, %v220_v25 }
 0x184   :  { %527 = vpow2.f32 %v221_v26 }
 0x191   :  { %v528_v28 = vpop.eup %527 }
 0x192   :  { %v298_v29 = vmul.f32 %v528_v28, %v218_v22  ;;  %504 = vmatpush3.msra.mxu0 %v528_v28 }
 0x193   :  { %506 = vmatmul.mubr.msk.f32.vlgmr.msra.gmra.mxu0 %vm224_vm2, %v223_v27 }
 0x194   :  { %509 = vmatpush3.msra.mxu1 %v298_v29 }
 0x195   :  { %511 = vmatmul.mubr.msk.f32.vlgmr.msra.gmra.mxu1 %vm224_vm2, %v223_v27 }
 0x253   :  { %v294_v41 = vpop.f32.mrf.mxu0 }
 0x254   :  { %529 = vrcp.f32 %v294_v41 }
 0x255   :  { %v507_v42 = vpop.f32.mrf.mxu0  ;;  %v365_v43 = vpop.f32.mrf.mxu1 }
 0x257   :  { %v512_v44 = vpop.f32.mrf.mxu1 }
 0x261   :  { %v530_v45 = vpop.eup %529 }
 0x262   :  { %v370_v46 = vmul.f32 %v530_v45, %v365_v43 }
 0x264   :  { %v482_v47 = vadd.f32 -0.01, %v370_v46 }
 0x266   :  { %v372_v48 = vmul.f32 20.0, %v482_v47 }
 0x268   :  { %v375_v49 = vsel %vm373_vm4, %v372_v48, -inf  ;;  %374 = vst.msk [vmem:[#allocation7] sm:$0xf] %vm373_vm4, %v372_v48 }
 0x269   :  { %v376_v50 = vrot.slane %v375_v49, 4 }
 0x26a   :  { %586 = shalt.err (!%p583_p0)
}
 0x26b   :  { %441 = dma.vmem_to_hbm [thread:$0]  %s439_s4, 64, %s737_s5, [#allocation4]   ;;  %v377_v51 = vmax.f32 %v375_v49, %v376_v50  ;;  %v419_v62 = vmul.f32 %v411_v33, %v372_v48 }
 0x26c   :  { %s650_s5 = smov [#allocation8]   ;;  %s651_s18 = smov [#allocation10]  }
 0x26d   :  { %v378_v52 = vrot.slane %v377_v51, 2  ;;  %v420_v1 = vsel %vm373_vm4, %v419_v62, 0.0  ;;  %s448_s17 = sshll.u32 %s650_s5, 4  ;;  %s458_s19 = sshll.u32 %s651_s18, 4  ;;  %s449_s17 = int_to_ptr.vmem [resolvable:$true] %s448_s17  ;;  %s459_s19 = int_to_ptr.vmem [resolvable:$true] %s458_s19 }
 0x26e   :  { %v421_v3 = vrot.slane %v420_v1, 4  ;;  %s595_s20 = scalar_lea.vmem %s449_s17, 16  ;;  %s599_s21 = scalar_lea.vmem %s449_s17, 32 }
 0x26f   :  { %v379_v53 = vmax.f32 %v377_v51, %v378_v52  ;;  %p596_p1 = scmp.ne.s32.totalorder %s449_s17, %s595_s20  ;;  %p600_p2 = scmp.lt.s32.totalorder %s449_s17, %s449_s17 }
 0x270   :  { %v422_v5 = vadd.f32 %v421_v3, %v420_v1  ;;  %p601_p3 = scmp.lt.s32.totalorder %s599_s21, %s595_s20 }
 0x271   :  { %v380_v54 = vrot.slane %v379_v53, 1 }
 0x272   :  { %v423_v6 = vrot.slane %v422_v5, 2  ;;  %p602_p4 = por %p601_p3, %p600_p2 }
 0x273   :  { %v381_v55 = vmax.f32 %v379_v53, %v380_v54 }
 0x274   :  { %v424_v7 = vadd.f32 %v423_v6, %v422_v5  ;;  %p603_p5 = pnand %p602_p4, %p596_p1 }
 0x275   :  { %v382_v56 = vsub.f32 %v372_v48, %v381_v55 }
 0x276   :  { %v425_v9 = vrot.slane %v424_v7, 1 }
 0x277   :  { %v383_v57 = vmul.f32 1.442695, %v382_v56 }
 0x278   :  { %v426_v12 = vadd.f32 %v425_v9, %v424_v7 }
 0x279   :  { %531 = vpow2.f32 %v383_v57 }
 0x286   :  { %v532_v58 = vpop.eup %531 }
 0x287   :  { %v385_v59 = vsel %vm373_vm4, %v532_v58, 0.0 }
 0x288   :  { %v386_v60 = vrot.slane %v385_v59, 4 }
 0x28a   :  { %v387_v61 = vadd.f32 %v386_v60, %v385_v59 }
 0x28c   :  { %v388_v63 = vrot.slane %v387_v61, 2 }
 0x28e   :  { %v389_v0 = vadd.f32 %v388_v63, %v387_v61 }
 0x290   :  { %v390_v2 = vrot.slane %v389_v0, 1 }
 0x292   :  { %v391_v4 = vadd.f32 %v390_v2, %v389_v0 }
 0x294   :  { %533 = vlog2.f32 %v391_v4 }
 0x2a1   :  { %v534_v8 = vpop.eup %533 }
 0x2a2   :  { %v393_v10 = vmul.f32 0.6931472, %v534_v8 }
 0x2a4   :  { %v394_v11 = vadd.f32 %v393_v10, %v381_v55 }
 0x2a6   :  { %v427_v13 = vmul.f32 %v418_v40, %v394_v11 }
 0x2a8   :  { %v428_v14 = vsub.f32 %v427_v13, %v426_v12 }
 0x2aa   :  { %430 = vst.msk [vmem:[#allocation8] sm:$0x1] %vm429_vm5, %v428_v14 }
 0x2ab   :  { %606 = shalt.err (!%p603_p5)
}
 0x2ac   :  { %451 = dma.vmem_to_hbm [thread:$0]  %s449_s17, 16, %s738_s6, [#allocation9]  }
 0x2ad   :  { %s615_s24 = scalar_lea.vmem %s459_s19, 16  ;;  %s619_s25 = scalar_lea.vmem %s459_s19, 32 }
 0x2ae   :  { %p616_p6 = scmp.ne.s32.totalorder %s459_s19, %s615_s24  ;;  %p620_p7 = scmp.lt.s32.totalorder %s459_s19, %s459_s19 }
 0x2af   :  { %p621_p8 = scmp.lt.s32.totalorder %s619_s25, %s615_s24 }
 0x2b1   :  { %p622_p9 = por %p621_p8, %p620_p7 }
 0x2b3   :  { %p623_p10 = pnand %p622_p9, %p616_p6 }
 0x2b5   :  { %626 = shalt.err (!%p623_p10)
}
 0x2b6   :  { %461 = dma.vmem_to_hbm [thread:$0]  %s459_s19, 16, %s739_s7, [#allocation9]  }
 0x2b7   :  { %639 = dma.done.wait [#allocation4], 64  }
 0x2b8   :  { %640 = vsyncadd [#allocation4], 4294967232 }
 0x2b9   :  { %641 = dma.done.wait [#allocation9], 32  }
 0x2ba   :  { %642 = vsyncadd [#allocation9], 4294967264 }
 0x2bb   :  { %471 = vsyncpa [#allocation3], 1 }
 0x2bc   :  { %472 = vsyncpa [#allocation6], 1 }
 0x2bd   :  { %473 = vsyncpa [#allocation4], 1 }
 0x2be   :  { %474 = vsyncpa [#allocation9], 1 }

</bundles_post_ra>
